<compile_context>
chip_gen: v5e
topology: v5e:2x2
jax: 0.10.0
libtpu: 0.0.40
codegen_flags: <defaults>
</compile_context>

<pallas_src>
import functools

import jax
import jax.numpy as jnp
from jax import lax
from jax.experimental import pallas as pl
from jax.experimental.pallas import tpu as pltpu


def _generator_kernel(xv_ref, xk_ref, wv_ref, bv_ref, wk_ref, bk_ref,
                      topic_ref, e_ref, *, n_topics, tile_v, vocab_size):
    """One vocab tile: 2 MXU matmuls (bf16 in / f32 acc) + topic mask + tanh + exp.

    The softmax denominator is finished in the wrapper: tanh bounds energy to
    [-1, 1] so exp never overflows and no cross-tile max pass is required.
    Every vocab tile is therefore independent -> grid axis is "parallel".
    """
    # ---- fc_V / fc_K for this vocab tile (MXU, f32 accumulation) ------------
    logits_v = jnp.dot(xv_ref[...], wv_ref[...],
                       preferred_element_type=jnp.float32) + bv_ref[...]
    logits_k = jnp.dot(xk_ref[...], wk_ref[...],
                       preferred_element_type=jnp.float32) + bk_ref[...]

    B, TV = logits_v.shape

    # ---- k = sum over topics of one-hot(topic_idx) ---------------------------
    col0 = pl.program_id(0) * tile_v                              # global column base
    vocab_iota = col0 + lax.broadcasted_iota(jnp.int32, (B, TV), 1)

    topic = topic_ref[...]                                        # [B, T] int32
    k = jnp.zeros((B, TV), jnp.float32)
    for t in range(n_topics):                                     # small static trip count
        k = k + (vocab_iota == topic[:, t:t + 1]).astype(jnp.float32)
    # Row 0 of the one-hot embedding is the zero vector -> zero that lane once.
    k = jnp.where(vocab_iota == 0, 0.0, k)
    v_mask = (k == 0.0).astype(jnp.float32)

    # ---- energy + unnormalized softmax ---------------------------------------
    energy = jnp.tanh(v_mask * logits_v + k * logits_k)           # in [-1, 1]
    e = jnp.exp(energy)
    if vocab_size % tile_v != 0:
        # Partial last tile: keep padded columns at exactly 0 (defensive; their
        # HBM writes are dropped anyway, and they never enter the denominator).
        e = jnp.where(vocab_iota < vocab_size, e, 0.0)
    e_ref[...] = e


def _pick_tile_v(vocab, dv, dk, batch, budget_bytes=8 << 20):
    """Largest vocab tile (multiple of 128) whose double-buffered VMEM footprint
    (bf16 weight tiles + f32 biases + f32 output tile) fits in `budget_bytes`."""
    per_col = 2 * ((dv + dk) * 2 + 2 * 4 + batch * 4)
    tv = max(128, (budget_bytes // per_col) // 128 * 128)
    return vocab if tv >= vocab else tv


def generator_forward(params, output, input_step, context, topic, *, tile_v=None):
    """JAX wrapper reproducing Generator.forward.

    output:     [1, B, hidden]
    input_step: [1, B, embed]
    context:    [1, B, hidden]
    topic:      (topic_indexs [B, T] int, topic_length)
    returns prob [B, vocab]  (softmax(...).squeeze())
    """
    topic_indexs, _topic_length = topic

    # bf16 weights / matmul activations (dominant HBM byte stream halved).
    wv = params["wv"].astype(jnp.bfloat16)
    wk = params["wk"].astype(jnp.bfloat16)
    bv = params["bv"].astype(jnp.float32)
    bk = params["bk"].astype(jnp.float32)

    # Glue: concat + squeeze seq dim (S == 1); keep the hot path in the kernel.
    xv = jnp.concatenate((output, input_step), axis=2)[0].astype(jnp.bfloat16)           # [B, H+E]
    xk = jnp.concatenate((output, input_step, context), axis=2)[0].astype(jnp.bfloat16)  # [B, 2H+E]

    B, dv = xv.shape
    dk = xk.shape[1]
    V = wv.shape[1]
    T = topic_indexs.shape[1]

    # Vocab tile: multiple of 128 (or the full vocab). Sized from a VMEM budget
    # so it fits v5e's 16 MiB scoped VMEM with double-buffering headroom.
    TV = _pick_tile_v(V, dv, dk, B) if tile_v is None else (V if V <= tile_v else tile_v)
    grid = (pl.cdiv(V, TV),)

    cost = pl.CostEstimate(
        flops=2 * B * (dv + dk) * V,
        transcendentals=2 * B * V,  # tanh + exp
        bytes_accessed=(dv + dk) * V * 2 + 2 * V * 4 + B * (dv + dk) * 2 + B * V * 4,
    )

    kernel = functools.partial(_generator_kernel, n_topics=T, tile_v=TV, vocab_size=V)
    e = pl.pallas_call(
        kernel,
        out_shape=jax.ShapeDtypeStruct((B, V), jnp.float32),
        grid=grid,
        in_specs=[
            pl.BlockSpec((B, dv), lambda j: (0, 0)),   # xv   (resident)
            pl.BlockSpec((B, dk), lambda j: (0, 0)),   # xk   (resident)
            pl.BlockSpec((dv, TV), lambda j: (0, j)),  # wv   (streamed per tile)
            pl.BlockSpec((1, TV), lambda j: (0, j)),   # bv
            pl.BlockSpec((dk, TV), lambda j: (0, j)),  # wk   (streamed per tile)
            pl.BlockSpec((1, TV), lambda j: (0, j)),   # bk
            pl.BlockSpec((B, T), lambda j: (0, 0)),    # topic indices (resident)
        ],
        out_specs=pl.BlockSpec((B, TV), lambda j: (0, j)),
        compiler_params=pltpu.CompilerParams(
            dimension_semantics=("parallel",)),
        cost_estimate=cost,
    )(xv, xk, wv, bv, wk, bk, topic_indexs.astype(jnp.int32))

    # Finish the softmax: tiny [B, V] reduction + divide, left to XLA.
    return e / jnp.sum(e, axis=-1, keepdims=True)


def init_params(key, vocab_size, embedding_size, hidden_size):
    """Deterministic nn.Linear-style init (uniform +-1/sqrt(fan_in)), f32 master."""
    kv_w, kv_b, kk_w, kk_b = jax.random.split(key, 4)
    dv = hidden_size + embedding_size
    dk = hidden_size * 2 + embedding_size
    lim_v = 1.0 / jnp.sqrt(dv)
    lim_k = 1.0 / jnp.sqrt(dk)
    return {
        "wv": jax.random.uniform(kv_w, (dv, vocab_size), jnp.float32, -lim_v, lim_v),
        "bv": jax.random.uniform(kv_b, (1, vocab_size), jnp.float32, -lim_v, lim_v),
        "wk": jax.random.uniform(kk_w, (dk, vocab_size), jnp.float32, -lim_k, lim_k),
        "bk": jax.random.uniform(kk_b, (1, vocab_size), jnp.float32, -lim_k, lim_k),
    }


def _reference_forward(params, output, input_step, context, topic):
    """Plain-JAX reference mirroring the PyTorch module (same bf16 weight cast)."""
    topic_indexs, _ = topic
    wv = params["wv"].astype(jnp.bfloat16)
    wk = params["wk"].astype(jnp.bfloat16)
    V = wv.shape[1]
    one_hot_w = jnp.eye(V, dtype=jnp.float32).at[0].set(0.0)
    k = jnp.sum(one_hot_w[topic_indexs], axis=1)                  # [B, V]
    v = (k == 0).astype(jnp.float32)
    xv = jnp.concatenate((output, input_step), axis=2).astype(jnp.bfloat16)           # [1, B, H+E]
    xk = jnp.concatenate((output, input_step, context), axis=2).astype(jnp.bfloat16)  # [1, B, 2H+E]
    fv = jnp.dot(xv, wv, preferred_element_type=jnp.float32) + params["bv"]
    fk = jnp.dot(xk, wk, preferred_element_type=jnp.float32) + params["bk"]
    energy = jnp.tanh(v * fv + k * fk)
    prob = jax.nn.softmax(energy, axis=-1)
    return jnp.squeeze(prob)                                      # [B, V]


if __name__ == "__main__":
    # Small shapes consistent with the module.
    VOCAB = 512
    EMBED = 16
    HIDDEN = 32
    B = 8
    T_TOPIC = 4
    TILE_V = 128      # small tile so the demo exercises a multi-step vocab grid

    root = jax.random.PRNGKey(0)
    k_par, k_out, k_inp, k_ctx, k_top = jax.random.split(root, 5)

    params = init_params(k_par, VOCAB, EMBED, HIDDEN)

    output = jax.random.normal(k_out, (1, B, HIDDEN), jnp.float32)
    input_step = jax.random.normal(k_inp, (1, B, EMBED), jnp.float32)
    context = jax.random.normal(k_ctx, (1, B, HIDDEN), jnp.float32)
    topic_indexs = jax.random.randint(k_top, (B, T_TOPIC), 0, VOCAB, jnp.int32)
    topic_length = jnp.full((B,), T_TOPIC, jnp.int32)  # unused by forward

    prob = generator_forward(params, output, input_step, context,
                             (topic_indexs, topic_length), tile_v=TILE_V)
    prob = jax.block_until_ready(prob)

    ref = _reference_forward(params, output, input_step, context,
                             (topic_indexs, topic_length))
    assert prob.shape == (B, VOCAB)
    assert jnp.allclose(prob, ref, atol=2e-5, rtol=1e-4), "mismatch vs reference"
    # Probabilities must sum to 1 per row.
    assert jnp.allclose(jnp.sum(prob, axis=-1), 1.0, atol=1e-5)

    print("KERNEL_OK")
</pallas_src>

<mosaic_0001>
module attributes {stable_mosaic.version = 11 : i64} {
  func.func @_generator_kernel(%arg0: i32, %arg1: memref<8x48xbf16, #tpu.memory_space<vmem>>, %arg2: memref<8x80xbf16, #tpu.memory_space<vmem>>, %arg3: memref<48x128xbf16, #tpu.memory_space<vmem>>, %arg4: memref<1x128xf32, #tpu.memory_space<vmem>>, %arg5: memref<80x128xbf16, #tpu.memory_space<vmem>>, %arg6: memref<1x128xf32, #tpu.memory_space<vmem>>, %arg7: memref<8x4xi32, #tpu.memory_space<vmem>>, %arg8: memref<8x128xf32, #tpu.memory_space<vmem>>) attributes {dimension_semantics = [#tpu.dimension_semantics<parallel>], iteration_bounds = array<i64: 4>, scalar_prefetch = 0 : i64, scratch_operands = 0 : i64, tpu.core_type = #tpu.core_type<tc>, window_params = [{pipeline_mode = #tpu.pipeline_mode<synchronous>, transform_indices = @transform_0, window_bounds = array<i64: 8, 48>}, {pipeline_mode = #tpu.pipeline_mode<synchronous>, transform_indices = @transform_1, window_bounds = array<i64: 8, 80>}, {transform_indices = @transform_2, window_bounds = array<i64: 48, 128>}, {transform_indices = @transform_3, window_bounds = array<i64: 1, 128>}, {transform_indices = @transform_4, window_bounds = array<i64: 80, 128>}, {transform_indices = @transform_5, window_bounds = array<i64: 1, 128>}, {pipeline_mode = #tpu.pipeline_mode<synchronous>, transform_indices = @transform_6, window_bounds = array<i64: 8, 4>}, {transform_indices = @transform_7, window_bounds = array<i64: 8, 128>}]} {
    %c0 = arith.constant 0 : index
    %c0_0 = arith.constant 0 : index
    %0 = vector.load %arg1[%c0, %c0_0] : memref<8x48xbf16, #tpu.memory_space<vmem>>, vector<8x48xbf16>
    %c0_1 = arith.constant 0 : index
    %c0_2 = arith.constant 0 : index
    %1 = vector.load %arg3[%c0_1, %c0_2] : memref<48x128xbf16, #tpu.memory_space<vmem>>, vector<48x128xbf16>
    %cst = arith.constant dense<0.000000e+00> : vector<8x128xf32>
    %2 = tpu.matmul %0, %1, %cst {dimension_numbers = #tpu.dot_dimension_numbers<[1], [0], [0], [1], [0, 0, 1, 1], [], []>} : vector<8x48xbf16>, vector<48x128xbf16>, vector<8x128xf32> -> vector<8x128xf32>
    %c0_3 = arith.constant 0 : index
    %c0_4 = arith.constant 0 : index
    %3 = vector.load %arg4[%c0_3, %c0_4] : memref<1x128xf32, #tpu.memory_space<vmem>>, vector<1x128xf32>
    %4 = vector.broadcast %3 : vector<1x128xf32> to vector<8x128xf32>
    %5 = arith.addf %2, %4 : vector<8x128xf32>
    %c0_5 = arith.constant 0 : index
    %c0_6 = arith.constant 0 : index
    %6 = vector.load %arg2[%c0_5, %c0_6] : memref<8x80xbf16, #tpu.memory_space<vmem>>, vector<8x80xbf16>
    %c0_7 = arith.constant 0 : index
    %c0_8 = arith.constant 0 : index
    %7 = vector.load %arg5[%c0_7, %c0_8] : memref<80x128xbf16, #tpu.memory_space<vmem>>, vector<80x128xbf16>
    %cst_9 = arith.constant dense<0.000000e+00> : vector<8x128xf32>
    %8 = tpu.matmul %6, %7, %cst_9 {dimension_numbers = #tpu.dot_dimension_numbers<[1], [0], [0], [1], [0, 0, 1, 1], [], []>} : vector<8x80xbf16>, vector<80x128xbf16>, vector<8x128xf32> -> vector<8x128xf32>
    %c0_10 = arith.constant 0 : index
    %c0_11 = arith.constant 0 : index
    %9 = vector.load %arg6[%c0_10, %c0_11] : memref<1x128xf32, #tpu.memory_space<vmem>>, vector<1x128xf32>
    %10 = vector.broadcast %9 : vector<1x128xf32> to vector<8x128xf32>
    %11 = arith.addf %8, %10 : vector<8x128xf32>
    %c128_i32 = arith.constant 128 : i32
    %12 = arith.muli %arg0, %c128_i32 : i32
    %13 = tpu.iota {dimensions = array<i32: 1>} : vector<8x128xi32>
    %14 = vector.broadcast %12 : i32 to vector<8x128xi32>
    %15 = arith.addi %14, %13 : vector<8x128xi32>
    %c0_12 = arith.constant 0 : index
    %c0_13 = arith.constant 0 : index
    %16 = vector.load %arg7[%c0_12, %c0_13] : memref<8x4xi32, #tpu.memory_space<vmem>>, vector<8x4xi32>
    %cst_14 = arith.constant 0.000000e+00 : f32
    %17 = vector.broadcast %cst_14 : f32 to vector<8x128xf32>
    %18 = vector.extract_strided_slice %16 {offsets = [0, 0], sizes = [8, 1], strides = [1, 1]} : vector<8x4xi32> to vector<8x1xi32>
    %19 = vector.broadcast %18 : vector<8x1xi32> to vector<8x128xi32>
    %20 = arith.cmpi eq, %15, %19 : vector<8x128xi32>
    %21 = arith.extui %20 : vector<8x128xi1> to vector<8x128xi32>
    %22 = arith.sitofp %21 : vector<8x128xi32> to vector<8x128xf32>
    %23 = arith.addf %17, %22 : vector<8x128xf32>
    %24 = vector.extract_strided_slice %16 {offsets = [0, 1], sizes = [8, 1], strides = [1, 1]} : vector<8x4xi32> to vector<8x1xi32>
    %25 = vector.broadcast %24 : vector<8x1xi32> to vector<8x128xi32>
    %26 = arith.cmpi eq, %15, %25 : vector<8x128xi32>
    %27 = arith.extui %26 : vector<8x128xi1> to vector<8x128xi32>
    %28 = arith.sitofp %27 : vector<8x128xi32> to vector<8x128xf32>
    %29 = arith.addf %23, %28 : vector<8x128xf32>
    %30 = vector.extract_strided_slice %16 {offsets = [0, 2], sizes = [8, 1], strides = [1, 1]} : vector<8x4xi32> to vector<8x1xi32>
    %31 = vector.broadcast %30 : vector<8x1xi32> to vector<8x128xi32>
    %32 = arith.cmpi eq, %15, %31 : vector<8x128xi32>
    %33 = arith.extui %32 : vector<8x128xi1> to vector<8x128xi32>
    %34 = arith.sitofp %33 : vector<8x128xi32> to vector<8x128xf32>
    %35 = arith.addf %29, %34 : vector<8x128xf32>
    %36 = vector.extract_strided_slice %16 {offsets = [0, 3], sizes = [8, 1], strides = [1, 1]} : vector<8x4xi32> to vector<8x1xi32>
    %37 = vector.broadcast %36 : vector<8x1xi32> to vector<8x128xi32>
    %38 = arith.cmpi eq, %15, %37 : vector<8x128xi32>
    %39 = arith.extui %38 : vector<8x128xi1> to vector<8x128xi32>
    %40 = arith.sitofp %39 : vector<8x128xi32> to vector<8x128xf32>
    %41 = arith.addf %35, %40 : vector<8x128xf32>
    %c0_i32 = arith.constant 0 : i32
    %42 = vector.broadcast %c0_i32 : i32 to vector<8x128xi32>
    %43 = arith.cmpi eq, %15, %42 : vector<8x128xi32>
    %cst_15 = arith.constant 0.000000e+00 : f32
    %44 = vector.broadcast %cst_15 : f32 to vector<8x128xf32>
    %45 = arith.select %43, %44, %41 : vector<8x128xi1>, vector<8x128xf32>
    %cst_16 = arith.constant 0.000000e+00 : f32
    %46 = vector.broadcast %cst_16 : f32 to vector<8x128xf32>
    %47 = arith.cmpf oeq, %45, %46 : vector<8x128xf32>
    %48 = arith.extui %47 : vector<8x128xi1> to vector<8x128xi32>
    %49 = arith.sitofp %48 : vector<8x128xi32> to vector<8x128xf32>
    %50 = arith.mulf %49, %5 : vector<8x128xf32>
    %51 = arith.mulf %45, %11 : vector<8x128xf32>
    %52 = arith.addf %50, %51 : vector<8x128xf32>
    %53 = math.tanh %52 : vector<8x128xf32>
    %54 = math.exp %53 : vector<8x128xf32>
    %c0_17 = arith.constant 0 : index
    %c0_18 = arith.constant 0 : index
    %55 = vector.load %arg8[%c0_17, %c0_18] : memref<8x128xf32, #tpu.memory_space<vmem>>, vector<8x128xf32>
    tpu.vector_store %arg8[%c0_17, %c0_18], %54 {strides = array<i32>} : memref<8x128xf32, #tpu.memory_space<vmem>>, vector<8x128xf32>,
    return
  }
  func.func @transform_0(%arg0: i32) -> (i32, i32) {
    %c0_i32 = arith.constant 0 : i32
    %c0_i32_0 = arith.constant 0 : i32
    %c0_i32_1 = arith.constant 0 : i32
    return %c0_i32, %c0_i32_0 : i32, i32
  }
  func.func @transform_1(%arg0: i32) -> (i32, i32) {
    %c0_i32 = arith.constant 0 : i32
    %c0_i32_0 = arith.constant 0 : i32
    %c0_i32_1 = arith.constant 0 : i32
    return %c0_i32, %c0_i32_0 : i32, i32
  }
  func.func @transform_2(%arg0: i32) -> (i32, i32) {
    %c0_i32 = arith.constant 0 : i32
    %c0_i32_0 = arith.constant 0 : i32
    return %c0_i32, %arg0 : i32, i32
  }
  func.func @transform_3(%arg0: i32) -> (i32, i32) {
    %c0_i32 = arith.constant 0 : i32
    %c0_i32_0 = arith.constant 0 : i32
    return %c0_i32, %arg0 : i32, i32
  }
  func.func @transform_4(%arg0: i32) -> (i32, i32) {
    %c0_i32 = arith.constant 0 : i32
    %c0_i32_0 = arith.constant 0 : i32
    return %c0_i32, %arg0 : i32, i32
  }
  func.func @transform_5(%arg0: i32) -> (i32, i32) {
    %c0_i32 = arith.constant 0 : i32
    %c0_i32_0 = arith.constant 0 : i32
    return %c0_i32, %arg0 : i32, i32
  }
  func.func @transform_6(%arg0: i32) -> (i32, i32) {
    %c0_i32 = arith.constant 0 : i32
    %c0_i32_0 = arith.constant 0 : i32
    %c0_i32_1 = arith.constant 0 : i32
    return %c0_i32, %c0_i32_0 : i32, i32
  }
  func.func @transform_7(%arg0: i32) -> (i32, i32) {
    %c0_i32 = arith.constant 0 : i32
    %c0_i32_0 = arith.constant 0 : i32
    return %c0_i32, %arg0 : i32, i32
  }
}

</mosaic_0001>

<bundles_post_ra>
// kernel: tpu_custom_call.1
= control target key start
LH: loop header
LB: loop body
LE: loop exit
PB: predicated region body
PF: predicated region fallthrough
CT: control target
= control target key end

     0   :  { %s1243_s0 = inlined_call_operand.vmem [shape: bf16[8,48], index: 0, kind: input, shape index: {}]   ;;  %s1244_s1 = inlined_call_operand.vmem [shape: bf16[8,80], index: 1, kind: input, shape index: {}]   ;;  %s1245_s2 = inlined_call_operand.hbm [shape: bf16[48,512], index: 2, kind: input, shape index: {}]   ;;  %s1246_s3 = inlined_call_operand.vmem [shape: f32[1,512], index: 3, kind: input, shape index: {}]   ;;  %s1247_s4 = inlined_call_operand.hbm [shape: bf16[80,512], index: 4, kind: input, shape index: {}]   ;;  %s1248_s5 = inlined_call_operand.hbm [shape: f32[1,512], index: 5, kind: input, shape index: {}]   ;;  %s1249_s6 = inlined_call_operand.vmem [shape: s32[8,4], index: 6, kind: input, shape index: {}]   ;;  %s1250_s7 = inlined_call_operand.hbm [shape: f32[8,512], index: 7, kind: output, shape index: {}]  }
   0x1   :  { %1260 = sst [smem:[#allocation17_spill]] %s1245_s2 }
   0x2   :  { %1261 = sst [smem:[#allocation18_spill]] %s1247_s4 }
   0x3   :  { %12 = vsyncpa [#allocation3], 0 }
   0x4   :  { %14 = vsyncpa [#allocation3 + $0x1], 0 }
   0x5   :  { %15 = vsyncpa [#allocation6], 0 }
   0x6   :  { %17 = vsyncpa [#allocation6 + $0x1], 0 }
   0x7   :  { %18 = vsyncpa [#allocation4], 0 }
   0x8   :  { %20 = vsyncpa [#allocation4 + $0x1], 0  ;;  %s1022_s24 = smov 0   ;;  %s1024_s25 = smov 0  }
   0x9   :  { %s1026_s26 = smov 0   ;;  %s1028_s27 = smov 0  }
   0xa LB: > { %1262 = sst [smem:[#allocation12_spill]] %s960_s24  ;;  %s1043_s28 = sadd.s32 4294967295, %s972_s27   ;;  %s972_s27 = sphi %s1028_s27, %s1280_s27   ;;  %s968_s26 = sphi %s1026_s26, %s1282_s26   ;;  %s964_s25 = sphi %s1024_s25, %s1284_s25   ;;  %s960_s24 = sphi %s1022_s24, %s1283_s24  }
   0xb   : > { %1263 = sst [smem:[#allocation13_spill]] %s968_s26  ;;  %s674_s29 = sadd.s32 4294967294, %s972_s27  }
   0xc   : > { %s1047_s30 = sadd.s32 1, %s972_s27   ;;  %s75_s8 = sadd.s32 1, %s968_s26 }
   0xd   : > { %1264 = sst [smem:[#allocation14_spill]] %s1047_s30  ;;  %s72_s9 = ssub.s32 %s972_s27, %s1047_s30 }
   0xe   : > { %p82_p0 = scmp.ne.s32.totalorder %s968_s26, %s964_s25  ;;  %p73_p1 = scmp.eq.s32.totalorder %s72_s9, 0 }
   0xf   : > { %p83_p2 = scmp.eq.s32.totalorder %s972_s27, 0  ;;  %p88_p3 = scmp.ne.s32.totalorder %s964_s25, %s960_s24 }
  0x10   : > { %p89_p4 = scmp.eq.s32.totalorder %s1043_s28, 0  ;;  %p211_p7 = scmp.eq.s32.totalorder %s1043_s28, 3 }
  0x11   : > { %s1059_s10 = scalar_select %p73_p1, %s968_s26, %s75_s8  }
  0x12   : > { %p84_p5 = por %p83_p2, %p82_p0  ;;  %p1061_p6 = por %p89_p4, %p88_p3 }
  0x13   : > { %1265 = sst [smem:[#allocation15_spill]] %s1059_s10  ;;  %p217_p8 = scmp.eq.s32.totalorder %s674_s29, 3 }
  0x14   : > { %p759_p9 = scmp.lt.s32.totalorder %s972_s27, 4  ;;  %p1067_p10 = por %p211_p7, %p82_p0 }
  0x15   : > { %p1071_p11 = por %p217_p8, %p88_p3  ;;  %s1076_s14 = sand.u32 1, %s968_s26  }
  0x16   : > { %s1251_s15 = sshll.u32 %s972_s27, 2  ;;  %p1079_p12 = pnand %p759_p9, %p84_p5 }
  0x17   : > { %s1268_s13 = scalar_select %p1071_p11, 1, 0 }
  0x18   : > { %s273_s17 = sand.u32 1, %s972_s27   ;;  %s734_s18 = smul.u32 40, %s1076_s14 }
  0x19   : > { %1269 = sst [smem:[#allocation16_spill]] %s1268_s13  ;;  %p679_p13 = scmp.ge.s32.totalorder %s972_s27, 1 }
  0x1a   : > { %s1271_s4 = sld [smem:[#allocation18_spill]]  ;;  %s277_s23 = scalar_lea.vmem [#allocation5], %s734_s18 }
  0x1b   : > { %s284_s29 = sshll.u32 %s277_s23, 4  ;;  %p309_p0 = scmp.lt.s32.totalorder %s972_s27, 5  ;;  %s285_s29 = int_to_ptr.vmem [resolvable:$true] %s284_s29 }
  0x1c   : > { %s1092_s8 = scalar_lea.sflag [#allocation6], %s273_s17  ;;  %p816_p2 = pneg %p1079_p12 }
  0x20   : > { %s281_s21 = scalar_lea.hbm %s1271_s4, %s1251_s15 }
  0x21   : > { %s282_s22 = sshll.u32 %s281_s21, 4  ;;  %s819_s21 = scalar_lea.hbm %s1271_s4, 160  ;;  %s283_s22 = int_to_ptr.hbm [resolvable:$true] %s282_s22 }
  0x22   : > { %s812_s9 = sshra.s32 %s283_s22, 4  ;;  %s813_s9 = int_to_ptr.hbm [resolvable:$true] %s812_s9 }
  0x23   : > { %s814_s10 = scalar_lea.hbm %s813_s9, 40  ;;  %p820_p5 = scmp.lt.s32.totalorder %s813_s9, %s1271_s4 }
  0x24   : > { %p815_p1 = scmp.ne.s32.totalorder %s813_s9, %s814_s10  ;;  %p821_p7 = scmp.lt.s32.totalorder %s819_s21, %s814_s10 }
  0x26   : > { %p817_p3 = pnand %p816_p2, %p815_p1  ;;  %p822_p8 = por %p821_p7, %p820_p5 }
  0x28   : > { %p818_p4 = pneg %p817_p3 }
  0x2a   : > { %p823_p9 = pnand %p822_p8, %p818_p4 }
  0x2c   : > { %826 = shalt.err (!%p823_p9)
}
  0x2d   : > { %s1257_s17 = smov 256   ;;  %s1258_s15 = smov 64  }
  0x2e   : > { %s1259_s19 = smov 4   ;;  %p1115_p1 = pnand %p679_p13, %p309_p0 }
  0x2f   : > { %751 = dma.hbm_to_vmem [thread:$0]  (!%p1079_p12), %s283_s22, 640, %s285_s29, %s1092_s8, %s1257_s17, %s1258_s15, %s1259_s19  }
  0x30   : > { %s733_s9 = smul.u32 24, %s1076_s14  ;;  %s1273_s20 = sshll.u32 %s972_s27, 2 }
  0x31   : > { %s1274_s2 = sld [smem:[#allocation17_spill]]  ;;  %s300_s22 = scalar_lea.hbm %s1248_s5, %s972_s27 }
  0x32   : > { %s250_s26 = scalar_lea.vmem [#allocation2], %s733_s9  ;;  %s1129_s29 = sshll.u32 %s300_s22, 4  ;;  %s303_s29 = int_to_ptr.hbm [resolvable:$true] %s1129_s29 }
  0x33   : > { %s257_s30 = sshll.u32 %s250_s26, 4  ;;  %s247_s17 = scalar_lea.sflag [#allocation3], %s1076_s14  ;;  %s258_s30 = int_to_ptr.vmem [resolvable:$true] %s257_s30 }
  0x37   : > { %s254_s23 = scalar_lea.hbm %s1274_s2, %s1273_s20  ;;  %s849_s26 = scalar_lea.hbm %s1274_s2, 96 }
  0x38   : > { %s255_s4 = sshll.u32 %s254_s23, 4  ;;  %s256_s4 = int_to_ptr.hbm [resolvable:$true] %s255_s4 }
  0x39   : > { %s842_s15 = sshra.s32 %s256_s4, 4  ;;  %s843_s15 = int_to_ptr.hbm [resolvable:$true] %s842_s15 }
  0x3a   : > { %s844_s19 = scalar_lea.hbm %s843_s15, 24  ;;  %p850_p4 = scmp.lt.s32.totalorder %s843_s15, %s1274_s2 }
  0x3b   : > { %p845_p13 = scmp.ne.s32.totalorder %s843_s15, %s844_s19  ;;  %p851_p5 = scmp.lt.s32.totalorder %s849_s26, %s844_s19 }
  0x3d   : > { %p847_p0 = pnand %p845_p13, %p816_p2  ;;  %p852_p7 = por %p851_p5, %p850_p4 }
  0x3f   : > { %p848_p3 = pneg %p847_p0 }
  0x41   : > { %p853_p8 = pnand %p852_p7, %p848_p3 }
  0x43   : > { %856 = shalt.err (!%p853_p8)
}
  0x44   : > { %s1275_s24 = smov 4   ;;  %s1276_s13 = smov 64  }
  0x45   : > { %s1277_s23 = smov 256   ;;  %s297_s22 = scalar_lea.vmem [#allocation7], %s1076_s14 }
  0x46   : > { %748 = dma.hbm_to_vmem [thread:$0]  (!%p1079_p12), %s256_s4, 384, %s258_s30, %s247_s17, %s1277_s23, %s1276_s13, %s1275_s24  }
  0x47   : > { %s304_s20 = sshll.u32 %s297_s22, 4  ;;  %s872_s21 = sshra.s32 %s303_s29, 4  ;;  %s305_s20 = int_to_ptr.vmem [resolvable:$true] %s304_s20  ;;  %s873_s21 = int_to_ptr.hbm [resolvable:$true] %s872_s21 }
  0x48   : > { %s874_s15 = scalar_lea.hbm %s873_s21, 1  ;;  %s879_s9 = scalar_lea.hbm %s1248_s5, 4 }
  0x49   : > { %p875_p9 = scmp.ne.s32.totalorder %s873_s21, %s874_s15  ;;  %p880_p3 = scmp.lt.s32.totalorder %s873_s21, %s1248_s5 }
  0x4a   : > { %p881_p4 = scmp.lt.s32.totalorder %s879_s9, %s874_s15 }
  0x4b   : > { %p877_p13 = pnand %p875_p9, %p816_p2 }
  0x4c   : > { %p882_p5 = por %p881_p4, %p880_p3 }
  0x4d   : > { %p878_p0 = pneg %p877_p13 }
  0x4f   : > { %p883_p7 = pnand %p882_p5, %p878_p0 }
  0x51   : > { %886 = shalt.err (!%p883_p7)
}
  0x52   : > { %754 = dma.hbm_to_vmem [thread:$0]  (!%p1079_p12), %s303_s29, 16, %s305_s20, %s1092_s8  }
  0x53   : > { %313 = sbr.rel (%p1115_p1) target bundleno = 266 (0x10a), region = 48  ;;  %s1163_s4 = sand.u32 (!%p1115_p1), 1, %s964_s25  }
  0x54   : > { %s735_s30 = smul.u32 (!%p1115_p1), 24, %s1163_s4  ;;  %s316_s2 = scalar_lea.sflag (!%p1115_p1), [#allocation3], %s1163_s4 }
  0x56   : > { %s319_s14 = scalar_lea.vmem (!%p1115_p1), [#allocation2], %s735_s30 }
  0x58   : > { %947 = dma.done.wait (%p1061_p6), %s316_s2, 384  }
  0x59   : > { %949 = vsyncadd (%p1061_p6), %s316_s2, 4294966912  ;;  %s325_s16 = sand.u32 1, %s1043_s28   ;;  %s736_s8 = smul.u32 40, %s1163_s4 }
  0x5a   : > { %s326_s17 = scalar_lea.sflag [#allocation6], %s325_s16 }
  0x5b   : > { %s1173_s10 = scalar_lea.vmem [#allocation5], %s736_s8 }
  0x5c   : > { %951 = dma.done.wait (%p1061_p6), %s326_s17, 656  }
  0x5d   : > { %953 = vsyncadd (%p1061_p6), %s326_s17, 4294966640  ;;  %v977_v0 = vmov 0   ;;  %v978_v1 = vmov 2   ;;  %v727_v2 = vld [vmem:[%s319_s14 + $0x10] sm:$0xff]  ;;  %v499_v4 = vld [vmem:[%s1249_s6] sm:$0xff]  ;;  %p382_p6 = scmp.lt.s32.totalorder %s1043_s28, 3  ;;  %v495_v15 = vlaneseq }
  0x5e   : > { %801 = vset.pattern.permute.xlu0 %v977_v0  ;;  %803 = vset.pattern.permute.xlu1 %v978_v1  ;;  %v732_v3 = vld [vmem:[%s1173_s10 + $0x20] sm:$0xff]  ;;  %v726_v5 = vld [vmem:[%s319_s14 + $0x8] sm:$0xff]  ;;  %v730_v8 = vld [vmem:[%s1173_s10 + $0x10] sm:$0xff]  ;;  %v979_v9 = vmov 1   ;;  %v980_v10 = vmov 3   ;;  %vm415_vm0 = vcmask 392192  }
  0x5f   : > { %501 = vperm.xlu0 %801, %v499_v4   ;;  %515 = vperm.xlu1 %803, %v499_v4   ;;  %v731_v6 = vld [vmem:[%s1173_s10 + $0x18] sm:$0xff]  ;;  %v725_v7 = vld [vmem:[%s319_s14] sm:$0xff]  ;;  %s1187_s11 = scalar_select %p382_p6, %s1043_s28, 3  ;;  %v729_v12 = vld [vmem:[%s1173_s10 + $0x8] sm:$0xff]  ;;  %vm477_vm1 = vcmask 654336   ;;  %v496_v16 = vand.u32 127, %v495_v15 }
  0x60   : > { %424 = vmatpush.bf16.msra.mxu0 %v727_v2  ;;  %484 = vmatpush.bf16.msra.mxu1 %v732_v3  ;;  %v386_v11 = vld [vmem:[%s1243_s0] sm:$0xf]  ;;  %v728_v13 = vld [vmem:[%s1173_s10] sm:$0xff]  ;;  %s338_s15 = scalar_lea.vmem [#allocation7], %s1163_s4  ;;  %s715_s9 = sshll.u32 %s1043_s28, 7  ;;  %v981_v21 = vmov 0.0  }
  0x61   : > { %s384_s22 = scalar_lea.vmem %s1246_s3, %s1187_s11  ;;  %v432_v14 = vld [vmem:[%s1244_s1] sm:$0xf]  ;;  %v497_v17 = vstv %s715_s9  ;;  %s680_s2 = sshll.u32 %s1163_s4, 3 }
  0x62   : > { %v498_v20 = vadd.s32 %v497_v17, %v496_v16  ;;  %v806_v33 = vld [vmem:[%s384_s22] ss:$0 sm:$0xff]  ;;  %s722_s14 = sshll.u32 %s1043_s28, 3  ;;  %s381_s10 = scalar_lea.vmem [#allocation8], %s680_s2 }
  0x63   : > { %v807_v34 = vld [vmem:[%s338_s15] ss:$0 sm:$0xff]  ;;  %s551_s17 = scalar_lea.hbm %s1250_s7, %s722_s14  ;;  %s553_s29 = sshll.u32 %s381_s10, 4  ;;  %s554_s29 = int_to_ptr.vmem [resolvable:$true] %s553_s29 }
  0x64   : > { %425 = vmatpush.bf16.msra.mxu0 %v726_v5  ;;  %485 = vmatpush.bf16.msra.mxu1 %v731_v6  ;;  %vm528_vm6 = vcmp.eq.s32.totalorder %v498_v20, 0  ;;  %s555_s24 = sshll.u32 %s551_s17, 4  ;;  %s541_s11 = scalar_lea.sflag [#allocation4], %s1163_s4  ;;  %s556_s24 = int_to_ptr.hbm [resolvable:$true] %s555_s24 }
  0x65   : > { %s916_s13 = sshra.s32 %s556_s24, 4  ;;  %s922_s20 = scalar_lea.hbm %s1250_s7, 32  ;;  %s917_s13 = int_to_ptr.hbm [resolvable:$true] %s916_s13 }
  0x66   : > { %s918_s23 = scalar_lea.hbm %s917_s13, 8  ;;  %p923_p8 = scmp.lt.s32.totalorder %s917_s13, %s1250_s7 }
  0x67   : > { %802 = vset.pattern.permute.xlu0 %v979_v9  ;;  %804 = vset.pattern.permute.xlu1 %v980_v10  ;;  %p919_p12 = scmp.ne.s32.totalorder %s917_s13, %s918_s23  ;;  %p924_p9 = scmp.lt.s32.totalorder %s922_s20, %s918_s23 }
  0x68   : > { %426 = vmatpush.bf16.msra.mxu0 %v725_v7  ;;  %486 = vmatpush.bf16.msra.mxu1 %v730_v8 }
  0x69   : > { %508 = vperm.xlu0 %802, %v499_v4   ;;  %522 = vperm.xlu1 %804, %v499_v4   ;;  %p920_p2 = pnand %p919_p12, %p1067_p10  ;;  %p925_p13 = por %p924_p9, %p923_p8 }
  0x6b   : > { %693 = vmatmul.msk.bf16.vlgmr.msra.gmra.mxu0 %vm415_vm0, %v386_v11  ;;  %p921_p1 = pneg %p920_p2 }
  0x6c   : > { %487 = vmatpush.bf16.msra.mxu1 %v729_v12 }
  0x6d   : > { %p926_p0 = pnand %p925_p13, %p921_p1 }
  0x70   : > { %488 = vmatpush.bf16.msra.mxu1 %v728_v13 }
  0x71   : > { %805 = vset.pattern.permute.xlu0 %v980_v10 }
  0x73   : > { %714 = vmatmul.msk.bf16.vlgmr.msra.gmra.mxu1 %vm477_vm1, %v432_v14 }
  0xd1   : > { %v502_v18 = vpop.permute.xlu0 %501  ;;  %v516_v19 = vpop.permute.xlu1 %515 }
  0xd2   : > { %vm503_vm2 = vcmp.eq.s32.totalorder %v498_v20, %v502_v18  ;;  %vm517_vm3 = vcmp.eq.s32.totalorder %v498_v20, %v516_v19 }
  0xd3   : > { %v716_v22 = vsel %vm503_vm2, 1.0, %v981_v21  ;;  %v718_v27 = vsel %vm517_vm3, 1.0, %v981_v21 }
  0xdb   : > { %v509_v23 = vpop.permute.xlu0 %508  ;;  %v523_v25 = vpop.permute.xlu1 %522 }
  0xdc   : > { %vm510_vm4 = vcmp.eq.s32.totalorder %v498_v20, %v509_v23  ;;  %vm524_vm5 = vcmp.eq.s32.totalorder %v498_v20, %v523_v25 }
  0xdd   : > { %v717_v24 = vsel %vm510_vm4, 1.0, %v981_v21  ;;  %v719_v29 = vsel %vm524_vm5, 1.0, %v981_v21 }
  0xde   : > { %v513_v26 = vadd.f32 %v717_v24, %v716_v22 }
  0xe0   : > { %v520_v28 = vadd.f32 %v718_v27, %v513_v26 }
  0xe2   : > { %v527_v30 = vadd.f32 %v719_v29, %v520_v28 }
  0xe4   : > { %v529_v32 = vsel %vm528_vm6, 0.0, %v527_v30 }
  0xe5   : > { %vm530_vm7 = vcmp.eq.f32.partialorder %v529_v32, 0.0 }
  0xe6   : > { %v720_v36 = vsel %vm530_vm7, 1.0, %v981_v21 }
  0xe8   : > { %v428_v31 = vpop.f32.mrf.mxu0 }
  0xe9   : > { %v429_v35 = vadd.f32 %v806_v33, %v428_v31 }
  0xeb   : > { %v533_v40 = vmul.f32 %v720_v36, %v429_v35 }
  0xf0   : > { %v430_v37 = vpop.f32.mrf.mxu0  ;;  %v490_v38 = vpop.f32.mrf.mxu1 }
  0xf1   : > { %v491_v39 = vadd.f32 %v807_v34, %v490_v38 }
  0xf3   : > { %v534_v41 = vmul.f32 %v529_v32, %v491_v39 }
  0xf5   : > { %v535_v42 = vadd.f32 %v534_v41, %v533_v40 }
  0xf7   : > { %808 = vtanh.f32 %v535_v42 }
  0xf8   : > { %v492_v43 = vpop.f32.mrf.mxu1 }
  0xfd   : > { %v809_v44 = vpop.eup %808 }
  0xfe   : > { %v537_v45 = vmul.f32 1.442695, %v809_v44 }
 0x100   : > { %810 = vpow2.f32 %v537_v45 }
 0x106   : > { %v811_v46 = vpop.eup %810 }
 0x107   : > { %539 = vst [vmem:[%s381_s10] sm:$0xff] %v811_v46 }
 0x108   : > { %929 = shalt.err (!%p926_p0)
}
 0x109   : > { %743 = dma.vmem_to_hbm [thread:$0]  (%p1067_p10), %s554_s29, 128, %s556_s24, %s541_s11  }
 0x10a PF: > { %s1278_s4 = sld [smem:[#allocation12_spill]]  ;;  %p760_p3 = scmp.ge.s32.totalorder %s972_s27, 2 }
 0x10c   : > { %p756_p4 = pnand %p760_p3, %p1071_p11 }
 0x10e   : > { %p757_p5 = pneg %p756_p4 }
 0x110   : > { %s567_s26 = sand.u32 1, %s1278_s4  }
 0x111   : > { %s568_s9 = scalar_lea.sflag [#allocation4], %s567_s26 }
 0x112   : > { %955 = dma.done.wait (%p757_p5), %s568_s9, 128  }
 0x113   : > { %957 = vsyncadd (%p757_p5), %s568_s9, 4294967168  ;;  %s1280_s27 = sld [smem:[#allocation14_spill]]  ;;  %s1283_s24 = smov %s964_s25 }
 0x114   : > { %s1281_s18 = sld [smem:[#allocation13_spill]] }
 0x115   : > { %s1282_s26 = sld [smem:[#allocation15_spill]] }
 0x119   : > { %p23_p7 = scmp.ge.s32.totalorder %s1280_s27, 6  }
 0x11a   : > { %s1284_s25 = smov %s1281_s18 }
 0x11b   :  { %25 = sbr.rel (!%p23_p7) target bundleno = 10 (0xa), region = 120 }
 0x120   :  { %574 = vsyncpa [#allocation3], 1 }
 0x121   :  { %576 = vsyncpa [#allocation3 + $0x1], 1 }
 0x122   :  { %577 = vsyncpa [#allocation6], 1 }
 0x123   :  { %579 = vsyncpa [#allocation6 + $0x1], 1 }
 0x124   :  { %580 = vsyncpa [#allocation4], 1 }
 0x125   :  { %582 = vsyncpa [#allocation4 + $0x1], 1 }

</bundles_post_ra>
